<compile_context>
chip_gen: v7x
topology: tpu7x:2x2x1
jax: 0.10.0
libtpu: 0.0.40
codegen_flags: <defaults>
</compile_context>

<pallas_src>
import jax
import jax.numpy as jnp
from jax.experimental import pallas as pl
from jax.experimental.pallas import tpu as pltpu


PACK = 4  # batch rows packed per lane row (state_dim 32 * 4 = 128 lanes)


def _round_up(n, m):
    return ((n + m - 1) // m) * m


def dueling_q_kernel(x_ref, w0_ref, w1_ref, wh1_ref, wq_ref, bias_ref, q_ref):
    """One batch tile (PACK batch rows per lane row): q = fused dueling MLP(x).

    All matmuls accumulate in f32; bias add / ReLU are f32.
    """
    h0 = w0_ref.shape[1]
    h1 = w1_ref.shape[1]
    hh = wh1_ref.shape[1]
    A = wq_ref.shape[1]
    cdt = w0_ref.dtype  # MXU operand dtype (bf16 default, f32 optional)

    # Packed biases (f32), one row per layer, zero-padded to a common width.
    b0 = bias_ref[0:1, 0:h0]
    b1 = bias_ref[1:2, 0:h1]
    bh = bias_ref[2:3, 0:hh]
    bq = bias_ref[3:4, 0:A]

    # Shared trunk: relu(x@W0+b0), relu(.@W1+b1).
    x = x_ref[...].astype(cdt)
    h = jnp.maximum(
        jnp.dot(x, w0_ref[...], preferred_element_type=jnp.float32) + b0, 0.0
    )
    h = jnp.maximum(
        jnp.dot(h.astype(cdt), w1_ref[...], preferred_element_type=jnp.float32) + b1,
        0.0,
    )

    # Fused value|advantage hidden layer (block-diag over the 4 packed rows).
    vh_ah = jnp.maximum(
        jnp.dot(h.astype(cdt), wh1_ref[...], preferred_element_type=jnp.float32) + bh,
        0.0,
    )

    # Fused final layer: Wq = [[Wv2 tiled over A], [Wa2 - rowmean]] (block-diag),
    # bq = bv2 + (ba2 - mean), so the matmul output is q = value + centered adv.
    q = jnp.dot(vh_ah.astype(cdt), wq_ref[...], preferred_element_type=jnp.float32) + bq
    q_ref[...] = q.astype(q_ref.dtype)


def prepare_fused_params(params, compute_dtype=jnp.bfloat16, pack=PACK):
    """Fold the dueling mean, fuse the heads, build block-diagonal packed
    weights for batch-in-lane packing, and pack biases.  One-time
    preprocessing; exact algebra (off-diagonal blocks are exact zeros)."""
    w0, b0 = params["w0"], params["b0"]
    w1, b1 = params["w1"], params["b1"]
    wv1, bv1 = params["wv1"], params["bv1"]
    wv2, bv2 = params["wv2"], params["bv2"]
    wa1, ba1 = params["wa1"], params["ba1"]
    wa2, ba2 = params["wa2"], params["ba2"]
    A = wa2.shape[1]

    # adv = a_h@Wa2 + ba2 - mean_A(...)  ==  a_h@(Wa2 - rowmean) + (ba2 - mean)
    wa2c = wa2 - jnp.mean(wa2, axis=1, keepdims=True)
    ba2c = ba2 - jnp.mean(ba2, axis=1, keepdims=True)

    # Head fusion.
    wh1 = jnp.concatenate([wv1, wa1], axis=1)                     # [h1, 2*half]
    bh1 = jnp.concatenate([bv1, ba1], axis=1)                     # [1, 2*half]
    wq = jnp.concatenate([jnp.tile(wv2, (1, A)), wa2c], axis=0)   # [2*half, A]
    bq = bv2 + ba2c                                               # [1, A]

    # Batch-in-lane packing: 4 batch rows share one lane row, so the weights
    # become 4-block block-diagonal and biases are tiled 4x along lanes.
    eye = jnp.eye(pack, dtype=jnp.float32)
    w0_bd = jnp.kron(eye, w0)          # [pack*S,  pack*h0]  = [128, 256]
    w1_bd = jnp.kron(eye, w1)          # [pack*h0, pack*h1]  = [256, 128]
    wh1_bd = jnp.kron(eye, wh1)        # [pack*h1, pack*hh]  = [128, 128]
    wq_bd = jnp.kron(eye, wq)          # [pack*hh, pack*A]   = [128, 16]
    b0_bd = jnp.tile(b0, (1, pack))
    b1_bd = jnp.tile(b1, (1, pack))
    bh_bd = jnp.tile(bh1, (1, pack))
    bq_bd = jnp.tile(bq, (1, pack))

    # Pack the four biases into one f32 blob (row-sliced in-kernel).
    width = max(b0_bd.shape[1], b1_bd.shape[1], bh_bd.shape[1], bq_bd.shape[1])
    bias = jnp.zeros((4, width), jnp.float32)
    bias = bias.at[0, : b0_bd.shape[1]].set(b0_bd[0])
    bias = bias.at[1, : b1_bd.shape[1]].set(b1_bd[0])
    bias = bias.at[2, : bh_bd.shape[1]].set(bh_bd[0])
    bias = bias.at[3, : bq_bd.shape[1]].set(bq_bd[0])

    cdt = compute_dtype
    return dict(
        w0=w0_bd.astype(cdt),
        w1=w1_bd.astype(cdt),
        wh1=wh1_bd.astype(cdt),
        wq=wq_bd.astype(cdt),
        bias=bias,  # biases stay f32 (added to f32 MXU accumulator output)
    )


def dueling_q_forward(x, fused, *, block_batch=8192):
    """x: [B, state_dim].  Returns q_value [B, num_actions] (f32).

    Batch is tiled into TB-row blocks (TB multiple of 8*PACK, ragged tail
    padded and sliced off); 4 batch rows are packed per lane row so every
    load/store/matmul is lane-dense; weights are VMEM-resident across the grid.
    """
    B, S = x.shape
    pack = fused["w0"].shape[0] // S
    A = fused["wq"].shape[1] // pack
    compute_dtype = fused["w0"].dtype

    align = 8 * pack  # packed sublane tiles must be multiples of 8
    block_batch = _round_up(block_batch, align)
    TB = min(block_batch, _round_up(B, align))
    Bp = _round_up(B, TB)
    # v7x megacore: prefer >= 2 batch tiles so the "parallel" grid axis can
    # shard across the two TensorCores (near no-op on v5e/v6e).
    if Bp // TB == 1 and TB >= 2 * align:
        TB = _round_up(TB // 2, align)
        Bp = _round_up(B, TB)
    TBp = TB // pack

    x = x.astype(compute_dtype)  # bf16 default halves the dominant HBM stream
    if Bp != B:
        x = jnp.pad(x, ((0, Bp - B), (0, 0)))
    xp = x.reshape(Bp // pack, pack * S)  # free row-major batch-in-lane repack

    def x_map(i):
        return (i, 0)

    def const_map(i):
        return (0, 0)

    out = pl.pallas_call(
        dueling_q_kernel,
        out_shape=jax.ShapeDtypeStruct((Bp // pack, pack * A), jnp.float32),
        grid=(Bp // TB,),
        in_specs=[
            pl.BlockSpec((TBp, pack * S), x_map),           # batch-tiled, lane-dense
            pl.BlockSpec(fused["w0"].shape, const_map),     # VMEM-resident weights
            pl.BlockSpec(fused["w1"].shape, const_map),
            pl.BlockSpec(fused["wh1"].shape, const_map),
            pl.BlockSpec(fused["wq"].shape, const_map),
            pl.BlockSpec(fused["bias"].shape, const_map),
        ],
        out_specs=pl.BlockSpec((TBp, pack * A), x_map),
        compiler_params=pltpu.CompilerParams(
            dimension_semantics=("parallel",),   # shard batch tiles across TCs (v7x)
            vmem_limit_bytes=32 * 1024 * 1024,   # cover v5e's 16 MiB scoped default
        ),
    )(xp, fused["w0"], fused["w1"], fused["wh1"], fused["wq"], fused["bias"])

    # Undo the batch-in-lane packing (free row-major reshape), drop padded rows.
    return out.reshape(Bp, A)[:B]


def init_params(key, layers=(32, 64, 32, 4)):
    """Deterministic gaussian init (gaussian_fill_w_gain-style scaling)."""
    state_dim, h0, h1, num_actions = layers
    half = h1 // 2
    gain = jnp.sqrt(2.0)  # relu gain

    def dense(k, fan_in, fan_out, scale):
        kw, _ = jax.random.split(k)
        w = jax.random.normal(kw, (fan_in, fan_out), jnp.float32) * scale
        b = jnp.zeros((1, fan_out), jnp.float32)
        return w, b

    keys = jax.random.split(key, 6)
    w0, b0 = dense(keys[0], state_dim, h0, gain * jnp.sqrt(1.0 / state_dim))
    w1, b1 = dense(keys[1], h0, h1, gain * jnp.sqrt(1.0 / h0))
    wv1, bv1 = dense(keys[2], h1, half, jnp.sqrt(1.0 / h1))
    wv2, bv2 = dense(keys[3], half, 1, jnp.sqrt(1.0 / half))
    wa1, ba1 = dense(keys[4], h1, half, jnp.sqrt(1.0 / h1))   # +action_dim == 0
    wa2, ba2 = dense(keys[5], half, num_actions, jnp.sqrt(1.0 / half))
    return dict(
        w0=w0, b0=b0, w1=w1, b1=b1,
        wv1=wv1, bv1=bv1, wv2=wv2, bv2=bv2,
        wa1=wa1, ba1=ba1, wa2=wa2, ba2=ba2,
    )


def dueling_q_reference(x, p):
    """Pure-JAX reference matching the PyTorch module (unfused weights)."""
    h = jnp.maximum(x @ p["w0"] + p["b0"], 0.0)
    h = jnp.maximum(h @ p["w1"] + p["b1"], 0.0)
    value = jnp.maximum(h @ p["wv1"] + p["bv1"], 0.0) @ p["wv2"] + p["bv2"]
    raw_adv = jnp.maximum(h @ p["wa1"] + p["ba1"], 0.0) @ p["wa2"] + p["ba2"]
    adv = raw_adv - jnp.mean(raw_adv, axis=1, keepdims=True)
    return value + adv


if __name__ == "__main__":
    key = jax.random.PRNGKey(0)
    k_params, k_x1, k_x2 = jax.random.split(key, 3)

    layers = (32, 64, 32, 4)
    params = init_params(k_params, layers)

    # 1) Small smoke test (B=8): single packed tile, grid=(1,), f32 end-to-end.
    B1 = 8
    x1 = jax.random.normal(k_x1, (B1, layers[0]), jnp.float32)
    fused_f32 = prepare_fused_params(params, compute_dtype=jnp.float32)
    q1 = jax.block_until_ready(dueling_q_forward(x1, fused_f32))
    q1_ref = dueling_q_reference(x1, params)
    assert q1.shape == (B1, layers[-1])
    assert jnp.allclose(q1, q1_ref, atol=3e-5, rtol=3e-5), float(
        jnp.max(jnp.abs(q1 - q1_ref))
    )

    # 2) Multi-tile test exercising the batch grid + ragged-tail padding (f32).
    B2 = 200
    x2 = jax.random.normal(k_x2, (B2, layers[0]), jnp.float32)
    q2 = jax.block_until_ready(dueling_q_forward(x2, fused_f32, block_batch=64))
    q2_ref = dueling_q_reference(x2, params)
    assert q2.shape == (B2, layers[-1])
    assert jnp.allclose(q2, q2_ref, atol=3e-5, rtol=3e-5), float(
        jnp.max(jnp.abs(q2 - q2_ref))
    )

    # 3) Default (bf16 operands, f32 accumulation) perf path; loose tolerance
    #    vs the f32 reference since the operands themselves are quantized.
    fused_bf16 = prepare_fused_params(params)  # bf16 default
    q3 = jax.block_until_ready(dueling_q_forward(x2, fused_bf16, block_batch=64))
    assert q3.shape == (B2, layers[-1])
    assert jnp.allclose(q3, q2_ref, atol=1e-1, rtol=1e-1), float(
        jnp.max(jnp.abs(q3 - q2_ref))
    )

    print("KERNEL_OK")
</pallas_src>

<mosaic_0001>
module attributes {stable_mosaic.version = 11 : i64} {
  func.func @dueling_q_kernel(%arg0: i32, %arg1: memref<8x128xf32, #tpu.memory_space<vmem>>, %arg2: memref<128x256xf32, #tpu.memory_space<vmem>>, %arg3: memref<256x128xf32, #tpu.memory_space<vmem>>, %arg4: memref<128x128xf32, #tpu.memory_space<vmem>>, %arg5: memref<128x16xf32, #tpu.memory_space<vmem>>, %arg6: memref<4x256xf32, #tpu.memory_space<vmem>>, %arg7: memref<8x16xf32, #tpu.memory_space<vmem>>) attributes {dimension_semantics = [#tpu.dimension_semantics<parallel>], iteration_bounds = array<i64: 1>, scalar_prefetch = 0 : i64, scratch_operands = 0 : i64, tpu.core_type = #tpu.core_type<tc>, window_params = [{transform_indices = @transform_0, window_bounds = array<i64: 8, 128>}, {pipeline_mode = #tpu.pipeline_mode<synchronous>, transform_indices = @transform_1, window_bounds = array<i64: 128, 256>}, {pipeline_mode = #tpu.pipeline_mode<synchronous>, transform_indices = @transform_2, window_bounds = array<i64: 256, 128>}, {pipeline_mode = #tpu.pipeline_mode<synchronous>, transform_indices = @transform_3, window_bounds = array<i64: 128, 128>}, {pipeline_mode = #tpu.pipeline_mode<synchronous>, transform_indices = @transform_4, window_bounds = array<i64: 128, 16>}, {pipeline_mode = #tpu.pipeline_mode<synchronous>, transform_indices = @transform_5, window_bounds = array<i64: 4, 256>}, {transform_indices = @transform_6, window_bounds = array<i64: 8, 16>}]} {
    %c0 = arith.constant 0 : index
    %c0_0 = arith.constant 0 : index
    %0 = vector.load %arg6[%c0, %c0_0] : memref<4x256xf32, #tpu.memory_space<vmem>>, vector<1x256xf32>
    %c1 = arith.constant 1 : index
    %c0_1 = arith.constant 0 : index
    %1 = vector.load %arg6[%c1, %c0_1] : memref<4x256xf32, #tpu.memory_space<vmem>>, vector<1x128xf32>
    %c2 = arith.constant 2 : index
    %c0_2 = arith.constant 0 : index
    %2 = vector.load %arg6[%c2, %c0_2] : memref<4x256xf32, #tpu.memory_space<vmem>>, vector<1x128xf32>
    %c3 = arith.constant 3 : index
    %c0_3 = arith.constant 0 : index
    %3 = vector.load %arg6[%c3, %c0_3] : memref<4x256xf32, #tpu.memory_space<vmem>>, vector<1x16xf32>
    %c0_4 = arith.constant 0 : index
    %c0_5 = arith.constant 0 : index
    %4 = vector.load %arg1[%c0_4, %c0_5] : memref<8x128xf32, #tpu.memory_space<vmem>>, vector<8x128xf32>
    %c0_6 = arith.constant 0 : index
    %c0_7 = arith.constant 0 : index
    %5 = vector.load %arg2[%c0_6, %c0_7] : memref<128x256xf32, #tpu.memory_space<vmem>>, vector<128x256xf32>
    %cst = arith.constant dense<0.000000e+00> : vector<8x256xf32>
    %6 = tpu.matmul %4, %5, %cst {dimension_numbers = #tpu.dot_dimension_numbers<[1], [0], [0], [1], [0, 0, 1, 1], [], []>} : vector<8x128xf32>, vector<128x256xf32>, vector<8x256xf32> -> vector<8x256xf32>
    %7 = vector.broadcast %0 : vector<1x256xf32> to vector<8x256xf32>
    %8 = arith.addf %6, %7 : vector<8x256xf32>
    %cst_8 = arith.constant 0.000000e+00 : f32
    %9 = vector.broadcast %cst_8 : f32 to vector<8x256xf32>
    %10 = arith.maximumf %8, %9 : vector<8x256xf32>
    %c0_9 = arith.constant 0 : index
    %c0_10 = arith.constant 0 : index
    %11 = vector.load %arg3[%c0_9, %c0_10] : memref<256x128xf32, #tpu.memory_space<vmem>>, vector<256x128xf32>
    %cst_11 = arith.constant dense<0.000000e+00> : vector<8x128xf32>
    %12 = tpu.matmul %10, %11, %cst_11 {dimension_numbers = #tpu.dot_dimension_numbers<[1], [0], [0], [1], [0, 0, 1, 1], [], []>} : vector<8x256xf32>, vector<256x128xf32>, vector<8x128xf32> -> vector<8x128xf32>
    %13 = vector.broadcast %1 : vector<1x128xf32> to vector<8x128xf32>
    %14 = arith.addf %12, %13 : vector<8x128xf32>
    %cst_12 = arith.constant 0.000000e+00 : f32
    %15 = vector.broadcast %cst_12 : f32 to vector<8x128xf32>
    %16 = arith.maximumf %14, %15 : vector<8x128xf32>
    %c0_13 = arith.constant 0 : index
    %c0_14 = arith.constant 0 : index
    %17 = vector.load %arg4[%c0_13, %c0_14] : memref<128x128xf32, #tpu.memory_space<vmem>>, vector<128x128xf32>
    %cst_15 = arith.constant dense<0.000000e+00> : vector<8x128xf32>
    %18 = tpu.matmul %16, %17, %cst_15 {dimension_numbers = #tpu.dot_dimension_numbers<[1], [0], [0], [1], [0, 0, 1, 1], [], []>} : vector<8x128xf32>, vector<128x128xf32>, vector<8x128xf32> -> vector<8x128xf32>
    %19 = vector.broadcast %2 : vector<1x128xf32> to vector<8x128xf32>
    %20 = arith.addf %18, %19 : vector<8x128xf32>
    %cst_16 = arith.constant 0.000000e+00 : f32
    %21 = vector.broadcast %cst_16 : f32 to vector<8x128xf32>
    %22 = arith.maximumf %20, %21 : vector<8x128xf32>
    %c0_17 = arith.constant 0 : index
    %c0_18 = arith.constant 0 : index
    %23 = vector.load %arg5[%c0_17, %c0_18] : memref<128x16xf32, #tpu.memory_space<vmem>>, vector<128x16xf32>
    %cst_19 = arith.constant dense<0.000000e+00> : vector<8x16xf32>
    %24 = tpu.matmul %22, %23, %cst_19 {dimension_numbers = #tpu.dot_dimension_numbers<[1], [0], [0], [1], [0, 0, 1, 1], [], []>} : vector<8x128xf32>, vector<128x16xf32>, vector<8x16xf32> -> vector<8x16xf32>
    %25 = vector.broadcast %3 : vector<1x16xf32> to vector<8x16xf32>
    %26 = arith.addf %24, %25 : vector<8x16xf32>
    %c0_20 = arith.constant 0 : index
    %c0_21 = arith.constant 0 : index
    %27 = vector.load %arg7[%c0_20, %c0_21] : memref<8x16xf32, #tpu.memory_space<vmem>>, vector<8x16xf32>
    tpu.vector_store %arg7[%c0_20, %c0_21], %26 {strides = array<i32>} : memref<8x16xf32, #tpu.memory_space<vmem>>, vector<8x16xf32>,
    return
  }
  func.func @transform_0(%arg0: i32) -> (i32, i32) {
    %c0_i32 = arith.constant 0 : i32
    %c0_i32_0 = arith.constant 0 : i32
    return %arg0, %c0_i32 : i32, i32
  }
  func.func @transform_1(%arg0: i32) -> (i32, i32) {
    %c0_i32 = arith.constant 0 : i32
    %c0_i32_0 = arith.constant 0 : i32
    %c0_i32_1 = arith.constant 0 : i32
    return %c0_i32, %c0_i32_0 : i32, i32
  }
  func.func @transform_2(%arg0: i32) -> (i32, i32) {
    %c0_i32 = arith.constant 0 : i32
    %c0_i32_0 = arith.constant 0 : i32
    %c0_i32_1 = arith.constant 0 : i32
    return %c0_i32, %c0_i32_0 : i32, i32
  }
  func.func @transform_3(%arg0: i32) -> (i32, i32) {
    %c0_i32 = arith.constant 0 : i32
    %c0_i32_0 = arith.constant 0 : i32
    %c0_i32_1 = arith.constant 0 : i32
    return %c0_i32, %c0_i32_0 : i32, i32
  }
  func.func @transform_4(%arg0: i32) -> (i32, i32) {
    %c0_i32 = arith.constant 0 : i32
    %c0_i32_0 = arith.constant 0 : i32
    %c0_i32_1 = arith.constant 0 : i32
    return %c0_i32, %c0_i32_0 : i32, i32
  }
  func.func @transform_5(%arg0: i32) -> (i32, i32) {
    %c0_i32 = arith.constant 0 : i32
    %c0_i32_0 = arith.constant 0 : i32
    %c0_i32_1 = arith.constant 0 : i32
    return %c0_i32, %c0_i32_0 : i32, i32
  }
  func.func @transform_6(%arg0: i32) -> (i32, i32) {
    %c0_i32 = arith.constant 0 : i32
    %c0_i32_0 = arith.constant 0 : i32
    return %arg0, %c0_i32 : i32, i32
  }
}

</mosaic_0001>

<bundles_post_ra>
// kernel: tpu_custom_call.1
= control target key start
LH: loop header
LB: loop body
LE: loop exit
PB: predicated region body
PF: predicated region fallthrough
CT: control target
= control target key end

     0   :  { %11 = vsyncpa [#allocation3], 0  ;;  %s1026_s0 = inlined_call_operand.vmem [shape: f32[8,128], index: 0, kind: input, shape index: {}]   ;;  %s1027_s1 = inlined_call_operand.hbm [shape: f32[128,256], index: 1, kind: input, shape index: {}]   ;;  %s1028_s2 = inlined_call_operand.hbm [shape: f32[256,128], index: 2, kind: input, shape index: {}]   ;;  %s1029_s3 = inlined_call_operand.vmem [shape: f32[128,128], index: 3, kind: input, shape index: {}]   ;;  %s1030_s4 = inlined_call_operand.vmem [shape: f32[128,16], index: 4, kind: input, shape index: {}]   ;;  %s1031_s5 = inlined_call_operand.vmem [shape: f32[4,256], index: 5, kind: input, shape index: {}]   ;;  %s1032_s6 = inlined_call_operand.hbm [shape: f32[8,16], index: 6, kind: output, shape index: {}]  }
   0x1   :  { %12 = vsyncpa [#allocation6], 0 }
   0x2   :  { %13 = vsyncpa [#allocation4], 0  ;;  %s815_s21 = smov [#allocation2]   ;;  %s743_s25 = scalar_lea.hbm %s1027_s1, 4096 }
   0x3   :  { %s21_s22 = sshll.u32 %s815_s21, 4  ;;  %p744_p0 = scmp.ne.s32.totalorder %s1027_s1, %s743_s25  ;;  %s22_s22 = int_to_ptr.vmem [resolvable:$true] %s21_s22 }
   0x4   :  { %p747_p1 = scmp.lt.u32.totalorder %s743_s25, %s1027_s1 }
   0x6   :  { %p749_p2 = pnand %p747_p1, %p744_p0 }
   0x8   :  { %752 = shalt.err (!%p749_p2)
}
   0x9   :  { %s753_s30 = scalar_lea.vmem %s22_s22, 4096  ;;  %p758_p4 = scmp.lt.s32.totalorder %s22_s22, %s22_s22 }
   0xa   :  { %p754_p3 = scmp.ne.s32.totalorder %s22_s22, %s753_s30  ;;  %p759_p5 = scmp.lt.s32.totalorder %s753_s30, %s753_s30 }
   0xc   :  { %p760_p6 = por %p759_p5, %p758_p4 }
   0xe   :  { %p761_p7 = pnand %p760_p6, %p754_p3 }
  0x10   :  { %764 = shalt.err (!%p761_p7)
}
  0x11   :  { %s816_s7 = smov 256   ;;  %s817_s8 = smov 16  }
  0x12   :  { %27 = dma.hbm_to_vmem [thread:$0]  %s1027_s1, 4096, %s22_s22, [#allocation3], %s816_s7, %s816_s7, %s817_s8  }
  0x13   :  { %s818_s11 = smov [#allocation5]   ;;  %s765_s15 = scalar_lea.hbm %s1028_s2, 4096 }
  0x14   :  { %s33_s12 = sshll.u32 %s818_s11, 4  ;;  %p766_p8 = scmp.ne.s32.totalorder %s1028_s2, %s765_s15  ;;  %s34_s12 = int_to_ptr.vmem [resolvable:$true] %s33_s12 }
  0x15   :  { %p769_p9 = scmp.lt.u32.totalorder %s765_s15, %s1028_s2 }
  0x17   :  { %p771_p10 = pnand %p769_p9, %p766_p8 }
  0x19   :  { %774 = shalt.err (!%p771_p10)
}
  0x1a   :  { %s775_s20 = scalar_lea.vmem %s34_s12, 4096  ;;  %p780_p12 = scmp.lt.s32.totalorder %s34_s12, %s34_s12 }
  0x1b   :  { %p776_p11 = scmp.ne.s32.totalorder %s34_s12, %s775_s20  ;;  %p781_p13 = scmp.lt.s32.totalorder %s775_s20, %s775_s20 }
  0x1d   :  { %p782_p0 = por %p781_p13, %p780_p12 }
  0x1f   :  { %p783_p1 = pnand %p782_p0, %p776_p11 }
  0x21   :  { %786 = shalt.err (!%p783_p1)
}
  0x22   :  { %s819_s1 = smov 128   ;;  %s820_s21 = smov 8  }
  0x23   :  { %39 = dma.hbm_to_vmem [thread:$0]  %s1028_s2, 4096, %s34_s12, [#allocation6], %s819_s1, %s819_s1, %s820_s21  }
  0x24   :  { %809 = dma.done.wait [#allocation3], 4096  }
  0x25   :  { %810 = vsyncadd [#allocation3], 4294963200 }
  0x26   :  { %811 = dma.done.wait [#allocation6], 4096  }
  0x27   :  { %812 = vsyncadd [#allocation6], 4294963200  ;;  %v821_v0 = vmov 0.0   ;;  %v58_v1 = vld [vmem:[#allocation2 + $0x8] sm:$0xff]  ;;  %v60_v2 = vld [vmem:[#allocation2 + $0x18] sm:$0xff]  ;;  %vm823_vm0 = vmmov 0  }
  0x28   :  { %164 = vmatprep.mubr.f32.mxu0 %v821_v0  ;;  %v57_v3 = vld [vmem:[#allocation2] sm:$0xff]  ;;  %v621_v4 = vpack.c.bf16 %v60_v2, %v58_v1  ;;  %v59_v5 = vld [vmem:[#allocation2 + $0x10] sm:$0xff]  ;;  %v62_v6 = vld [vmem:[#allocation2 + $0x28] sm:$0xff]  ;;  %s824_s16 = smov [#allocation7]   ;;  %vm461_vm1 = vcmask 130048  }
  0x29   :  { %v64_v7 = vld [vmem:[#allocation2 + $0x38] sm:$0xff]  ;;  %v623_v8 = vpack.c.bf16 %v59_v5, %v57_v3  ;;  %v61_v10 = vld [vmem:[#allocation2 + $0x20] sm:$0xff]  ;;  %v63_v11 = vld [vmem:[#allocation2 + $0x30] sm:$0xff]  ;;  %s469_s17 = sshll.u32 %s824_s16, 4  ;;  %s470_s17 = int_to_ptr.vmem [resolvable:$true] %s469_s17 }
  0x2a   :  { %v625_v9 = vpack.c.bf16 %v64_v7, %v62_v6  ;;  %v66_v12 = vld [vmem:[#allocation2 + $0x48] sm:$0xff]  ;;  %622 = vmatprep.subr.bf16.mxu0 %v621_v4  ;;  %v68_v13 = vld [vmem:[#allocation2 + $0x58] sm:$0xff]  ;;  %v627_v14 = vpack.c.bf16 %v63_v11, %v61_v10  ;;  %v65_v16 = vld [vmem:[#allocation2 + $0x40] sm:$0xff]  ;;  %p792_p3 = scmp.lt.s32.totalorder %s470_s17, %s470_s17 }
  0x2b   :  { %624 = vmatpush1.bf16.msra.mxu0 %v623_v8  ;;  %v629_v15 = vpack.c.bf16 %v68_v13, %v66_v12  ;;  %v67_v17 = vld [vmem:[#allocation2 + $0x50] sm:$0xff]  ;;  %v70_v18 = vld [vmem:[#allocation2 + $0x68] sm:$0xff]  ;;  %v72_v19 = vld [vmem:[#allocation2 + $0x78] sm:$0xff] }
  0x2c   :  { %626 = vmatprep.subr.bf16.mxu0 %v625_v9  ;;  %v631_v20 = vpack.c.bf16 %v67_v17, %v65_v16  ;;  %v633_v21 = vpack.c.bf16 %v72_v19, %v70_v18  ;;  %v69_v22 = vld [vmem:[#allocation2 + $0x60] sm:$0xff]  ;;  %v71_v23 = vld [vmem:[#allocation2 + $0x70] sm:$0xff]  ;;  %v74_v24 = vld [vmem:[#allocation2 + $0x88] sm:$0xff] }
  0x2d   :  { %v76_v25 = vld [vmem:[#allocation2 + $0x98] sm:$0xff]  ;;  %v73_v26 = vld [vmem:[#allocation2 + $0x80] sm:$0xff]  ;;  %v75_v27 = vld [vmem:[#allocation2 + $0x90] sm:$0xff]  ;;  %v635_v31 = vpack.c.bf16 %v71_v23, %v69_v22 }
  0x2e   :  { %v189_v28 = vld [vmem:[#allocation5 + $0x80] sm:$0xff]  ;;  %v190_v29 = vld [vmem:[#allocation5 + $0x88] sm:$0xff]  ;;  %v191_v34 = vld [vmem:[#allocation5 + $0x90] sm:$0xff]  ;;  %v637_v36 = vpack.c.bf16 %v76_v25, %v74_v24  ;;  %v639_v46 = vpack.c.bf16 %v75_v27, %v73_v26 }
  0x2f   :  { %628 = vmatpush1.bf16.msra.mxu0 %v627_v14  ;;  %v173_v30 = vld [vmem:[#allocation5] sm:$0xff]  ;;  %v653_v32 = vpack.c.bf16 %v190_v29, %v189_v28  ;;  %v174_v33 = vld [vmem:[#allocation5 + $0x8] sm:$0xff]  ;;  %v192_v35 = vld [vmem:[#allocation5 + $0x98] sm:$0xff] }
  0x30   :  { %630 = vmatprep.subr.bf16.mxu0 %v629_v15  ;;  %v655_v37 = vpack.c.bf16 %v174_v33, %v173_v30  ;;  %v657_v38 = vpack.c.bf16 %v192_v35, %v191_v34  ;;  %v175_v39 = vld [vmem:[#allocation5 + $0x10] sm:$0xff]  ;;  %v176_v40 = vld [vmem:[#allocation5 + $0x18] sm:$0xff]  ;;  %v193_v41 = vld [vmem:[#allocation5 + $0xa0] sm:$0xff] }
  0x31   :  { %v78_v42 = vld [vmem:[#allocation2 + $0xa8] sm:$0xff]  ;;  %v80_v43 = vld [vmem:[#allocation2 + $0xb8] sm:$0xff]  ;;  %654 = vmatprep.subr.bf16.mxu1 %v653_v32  ;;  %v659_v45 = vpack.c.bf16 %v176_v40, %v175_v39  ;;  %v77_v47 = vld [vmem:[#allocation2 + $0xa0] sm:$0xff] }
  0x32   :  { %v194_v44 = vld [vmem:[#allocation5 + $0xa8] sm:$0xff]  ;;  %656 = vmatpush3.bf16.msra.mxu1 %v655_v37  ;;  %v177_v49 = vld [vmem:[#allocation5 + $0x20] sm:$0xff]  ;;  %v641_v51 = vpack.c.bf16 %v80_v43, %v78_v42  ;;  %v79_v52 = vld [vmem:[#allocation2 + $0xb0] sm:$0xff] }
  0x33   :  { %632 = vmatpush1.bf16.msra.mxu0 %v631_v20  ;;  %658 = vmatprep.subr.bf16.mxu1 %v657_v38  ;;  %v661_v48 = vpack.c.bf16 %v194_v44, %v193_v41  ;;  %v178_v50 = vld [vmem:[#allocation5 + $0x28] sm:$0xff]  ;;  %v195_v53 = vld [vmem:[#allocation5 + $0xb0] sm:$0xff]  ;;  %v196_v54 = vld [vmem:[#allocation5 + $0xb8] sm:$0xff]  ;;  %v643_v58 = vpack.c.bf16 %v79_v52, %v77_v47  ;;  %v822_v38 = vmov 0.0|0.0  }
  0x34   :  { %634 = vmatprep.subr.bf16.mxu0 %v633_v21  ;;  %v82_v55 = vld [vmem:[#allocation2 + $0xc8] sm:$0xff]  ;;  %v84_v56 = vld [vmem:[#allocation2 + $0xd8] sm:$0xff]  ;;  %v663_v57 = vpack.c.bf16 %v178_v50, %v177_v49  ;;  %v81_v59 = vld [vmem:[#allocation2 + $0xc0] sm:$0xff]  ;;  %v665_v60 = vpack.c.bf16 %v196_v54, %v195_v53  ;;  %v90_v54 = vlaneseq }
  0x35   :  { %v179_v61 = vld [vmem:[#allocation5 + $0x30] sm:$0xff]  ;;  %v180_v62 = vld [vmem:[#allocation5 + $0x38] sm:$0xff]  ;;  %v645_v63 = vpack.c.bf16 %v84_v56, %v82_v55  ;;  %v197_v2 = vld [vmem:[#allocation5 + $0xc0] sm:$0xff] }
  0x36   :  { %660 = vmatpush3.bf16.msra.mxu1 %v659_v45  ;;  %v83_v1 = vld [vmem:[#allocation2 + $0xd0] sm:$0xff]  ;;  %v198_v3 = vld [vmem:[#allocation5 + $0xc8] sm:$0xff]  ;;  %v88_v5 = vld [vmem:[#allocation2 + $0xf8] sm:$0xff]  ;;  %v667_v6 = vpack.c.bf16 %v180_v62, %v179_v61  ;;  %v91_v55 = vshrl.u32 %v90_v54, 7 }
  0x37   :  { %636 = vmatpush1.bf16.msra.mxu0 %v635_v31  ;;  %662 = vmatprep.subr.bf16.mxu1 %v661_v48  ;;  %v86_v4 = vld [vmem:[#allocation2 + $0xe8] sm:$0xff]  ;;  %v647_v7 = vpack.c.bf16 %v83_v1, %v81_v59  ;;  %v85_v8 = vld [vmem:[#allocation2 + $0xe0] sm:$0xff]  ;;  %v669_v9 = vpack.c.bf16 %v198_v3, %v197_v2  ;;  %v87_v13 = vld [vmem:[#allocation2 + $0xf0] sm:$0xff] }
  0x38   :  { %638 = vmatprep.subr.bf16.mxu0 %v637_v36  ;;  %v181_v10 = vld [vmem:[#allocation5 + $0x40] sm:$0xff]  ;;  %v182_v11 = vld [vmem:[#allocation5 + $0x48] sm:$0xff]  ;;  %v649_v12 = vpack.c.bf16 %v88_v5, %v86_v4  ;;  %v199_v14 = vld [vmem:[#allocation5 + $0xd0] sm:$0xff]  ;;  %v651_v17 = vpack.c.bf16 %v87_v13, %v85_v8  ;;  %v92_v56 = vsub.s32 0, %v91_v55 }
  0x39   :  { %v200_v15 = vld [vmem:[#allocation5 + $0xd8] sm:$0xff]  ;;  %v671_v16 = vpack.c.bf16 %v182_v11, %v181_v10  ;;  %v183_v19 = vld [vmem:[#allocation5 + $0x50] sm:$0xff]  ;;  %v201_v21 = vld [vmem:[#allocation5 + $0xe0] sm:$0xff] }
  0x3a   :  { %664 = vmatpush3.bf16.msra.mxu1 %v663_v57  ;;  %v673_v18 = vpack.c.bf16 %v200_v15, %v199_v14  ;;  %v184_v20 = vld [vmem:[#allocation5 + $0x58] sm:$0xff]  ;;  %v202_v22 = vld [vmem:[#allocation5 + $0xe8] sm:$0xff]  ;;  %v56_v24 = vld [vmem:[%s1026_s0] sm:$0xff] }
  0x3b   :  { %640 = vmatpush1.bf16.msra.mxu0 %v639_v46  ;;  %666 = vmatprep.subr.bf16.mxu1 %v665_v60  ;;  %v675_v23 = vpack.c.bf16 %v184_v20, %v183_v19  ;;  %v677_v25 = vpack.c.bf16 %v202_v22, %v201_v21  ;;  %v185_v26 = vld [vmem:[#allocation5 + $0x60] sm:$0xff]  ;;  %v186_v27 = vld [vmem:[#allocation5 + $0x68] sm:$0xff]  ;;  %v203_v29 = vld [vmem:[#allocation5 + $0xf0] sm:$0xff] }
  0x3c   :  { %642 = vmatprep.subr.bf16.mxu0 %v641_v51  ;;  %v679_v28 = vpack.c.bf16 %v186_v27, %v185_v26  ;;  %v204_v30 = vld [vmem:[#allocation5 + $0xf8] sm:$0xff]  ;;  %v187_v32 = vld [vmem:[#allocation5 + $0x70] sm:$0xff]  ;;  %v280_v35 = vld [vmem:[%s1029_s3] sm:$0xff] }
  0x3d   :  { %v681_v31 = vpack.c.bf16 %v204_v30, %v203_v29  ;;  %v188_v33 = vld [vmem:[#allocation5 + $0x78] sm:$0xff]  ;;  %v281_v36 = vld [vmem:[%s1029_s3 + $0x8] sm:$0xff]  ;;  %v282_v37 = vld [vmem:[%s1029_s3 + $0x10] sm:$0xff] }
  0x3e   :  { %668 = vmatpush3.bf16.msra.mxu1 %v667_v6  ;;  %v683_v34 = vpack.c.bf16 %v188_v33, %v187_v32  ;;  %v686_v39 = vpack.c.bf16 %v281_v36, %v280_v35  ;;  %v283_v40 = vld [vmem:[%s1029_s3 + $0x18] sm:$0xff]  ;;  %v284_v42 = vld [vmem:[%s1029_s3 + $0x20] sm:$0xff]  ;;  %v285_v43 = vld [vmem:[%s1029_s3 + $0x28] sm:$0xff] }
  0x3f   :  { %644 = vmatpush1.bf16.msra.mxu0 %v643_v58  ;;  %670 = vmatprep.subr.bf16.mxu1 %v669_v9  ;;  %v689_v41 = vpack.c.bf16 %v283_v40, %v282_v37  ;;  %v692_v44 = vpack.c.bf16 %v285_v43, %v284_v42  ;;  %v286_v45 = vld [vmem:[%s1029_s3 + $0x30] sm:$0xff]  ;;  %v287_v46 = vld [vmem:[%s1029_s3 + $0x38] sm:$0xff]  ;;  %v288_v48 = vld [vmem:[%s1029_s3 + $0x40] sm:$0xff]  ;;  %v96_v58 = vsub.s32 1, %v91_v55 }
  0x40   :  { %646 = vmatprep.subr.bf16.mxu0 %v645_v63  ;;  %v695_v47 = vpack.c.bf16 %v287_v46, %v286_v45  ;;  %v289_v49 = vld [vmem:[%s1029_s3 + $0x48] sm:$0xff]  ;;  %v290_v51 = vld [vmem:[%s1029_s3 + $0x50] sm:$0xff]  ;;  %v291_v52 = vld [vmem:[%s1029_s3 + $0x58] sm:$0xff] }
  0x41   :  { %v698_v50 = vpack.c.bf16 %v289_v49, %v288_v48  ;;  %v701_v53 = vpack.c.bf16 %v291_v52, %v290_v51  ;;  %v52_v57 = vld [vmem:[%s1031_s5] ss:$4 sm:$0x3]  ;;  %v293_v5 = vld [vmem:[%s1029_s3 + $0x68] sm:$0xff]  ;;  %v295_v8 = vld [vmem:[%s1029_s3 + $0x78] sm:$0xff] }
  0x42   :  { %672 = vmatpush3.bf16.msra.mxu1 %v671_v16  ;;  %v93_v59 = vrot.slane %v52_v57, %v92_v56  ;;  %v97_v60 = vrot.slane %v52_v57, %v96_v58  ;;  %v292_v4 = vld [vmem:[%s1029_s3 + $0x60] sm:$0xff]  ;;  %v372_v11 = vld [vmem:[%s1030_s4 + $0x8] sm:$0xff]  ;;  %v374_v14 = vld [vmem:[%s1030_s4 + $0x18] sm:$0xff] }
  0x43   :  { %648 = vmatpush1.bf16.msra.mxu0 %v647_v7  ;;  %674 = vmatprep.subr.bf16.mxu1 %v673_v18  ;;  %v704_v6 = vpack.c.bf16 %v293_v5, %v292_v4  ;;  %v294_v7 = vld [vmem:[%s1029_s3 + $0x70] sm:$0xff]  ;;  %v371_v10 = vld [vmem:[%s1030_s4] sm:$0xff]  ;;  %v376_v16 = vld [vmem:[%s1030_s4 + $0x28] sm:$0xff] }
  0x44   :  { %650 = vmatprep.subr.bf16.mxu0 %v649_v12  ;;  %v707_v9 = vpack.c.bf16 %v295_v8, %v294_v7  ;;  %v373_v12 = vld [vmem:[%s1030_s4 + $0x10] sm:$0xff]  ;;  %v710_v13 = vpack.c.bf16 %v372_v11, %v371_v10  ;;  %v378_v19 = vld [vmem:[%s1030_s4 + $0x38] sm:$0xff]  ;;  %v379_v21 = vld [vmem:[%s1030_s4 + $0x40] sm:$0xff] }
  0x45   :  { %v713_v15 = vpack.c.bf16 %v374_v14, %v373_v12  ;;  %v377_v18 = vld [vmem:[%s1030_s4 + $0x30] sm:$0xff]  ;;  %v380_v22 = vld [vmem:[%s1030_s4 + $0x48] sm:$0xff]  ;;  %v383_v27 = vld [vmem:[%s1030_s4 + $0x60] sm:$0xff] }
  0x46   :  { %676 = vmatpush3.bf16.msra.mxu1 %v675_v23  ;;  %v719_v20 = vpack.c.bf16 %v378_v19, %v377_v18  ;;  %v722_v23 = vpack.c.bf16 %v380_v22, %v379_v21  ;;  %v385_v36 = vld [vmem:[%s1030_s4 + $0x70] sm:$0xff]  ;;  %v386_v37 = vld [vmem:[%s1030_s4 + $0x78] sm:$0xff] }
  0x47   :  { %652 = vmatpush1.bf16.msra.mxu0 %v651_v17  ;;  %678 = vmatprep.subr.bf16.mxu1 %v677_v25  ;;  %v382_v25 = vld [vmem:[%s1030_s4 + $0x58] sm:$0xff] }
  0x48   :  { %685 = vmatprep.subr.bf16.mxu0 %v822_v38 }
  0x4a   :  { %165 = vmatmul.mubr.f32.vlgmr.msra.gmra.mrb[0].mxu0 %v56_v24  ;;  %680 = vmatpush3.bf16.msra.mxu1 %v679_v28  ;;  %v381_v24 = vld [vmem:[%s1030_s4 + $0x50] sm:$0xff]  ;;  %v384_v28 = vld [vmem:[%s1030_s4 + $0x68] sm:$0xff] }
  0x4b   :  { %682 = vmatprep.subr.bf16.mxu1 %v681_v31  ;;  %687 = vmatpush3.bf16.msra.mxu0 %v686_v39  ;;  %v725_v26 = vpack.c.bf16 %v382_v25, %v381_v24  ;;  %v728_v29 = vpack.c.bf16 %v384_v28, %v383_v27  ;;  %v479_v31 = vld [vmem:[%s1031_s5 + $0x1] ss:$0 sm:$0xff]  ;;  %v731_v39 = vpack.c.bf16 %v386_v37, %v385_v36 }
  0x4c   :  { %688 = vmatprep.subr.bf16.mxu0 %v822_v38  ;;  %583 = vmatprep.mubr.msk.f32.mxu0 %vm823_vm0, %v821_v0 }
  0x4e   :  { %684 = vmatpush3.bf16.msra.mxu1 %v683_v34 }
  0x4f   :  { %709 = vmatprep.subr.bf16.mxu1 %v822_v38  ;;  %690 = vmatpush3.bf16.msra.mxu0 %v689_v41 }
  0x50   :  { %691 = vmatprep.subr.bf16.mxu0 %v822_v38 }
  0x53   :  { %693 = vmatpush3.bf16.msra.mxu0 %v692_v44  ;;  %v481_v44 = vld [vmem:[%s1031_s5 + $0x3] ss:$0 sm:$0xff] }
  0x54   :  { %694 = vmatprep.subr.bf16.mxu0 %v822_v38 }
  0x57   :  { %696 = vmatpush3.bf16.msra.mxu0 %v695_v47 }
  0x58   :  { %697 = vmatprep.subr.bf16.mxu0 %v822_v38 }
  0x5b   :  { %699 = vmatpush3.bf16.msra.mxu0 %v698_v50 }
  0x5c   :  { %700 = vmatprep.subr.bf16.mxu0 %v822_v38 }
  0x5f   :  { %702 = vmatpush3.bf16.msra.mxu0 %v701_v53 }
  0x60   :  { %703 = vmatprep.subr.bf16.mxu0 %v822_v38 }
  0x63   :  { %705 = vmatpush3.bf16.msra.mxu0 %v704_v6 }
  0x64   :  { %706 = vmatprep.subr.bf16.mxu0 %v822_v38 }
  0x67   :  { %708 = vmatpush3.bf16.msra.mxu0 %v707_v9 }
 0x11d   :  { %v166_v61 = vpop.f32.mrb[0].mxu0 }
 0x11e   :  { %v167_v62 = vadd.f32 %v166_v61, %v93_v59  ;;  %v168_v63 = vpop.f32.mrb[1].mxu0 }
 0x11f   :  { %v169_v1 = vadd.f32 %v168_v63, %v97_v60 }
 0x120   :  { %v171_v3 = vmax.f32 %v167_v62, 0.0 }
 0x121   :  { %v172_v2 = vmax.f32 %v169_v1, 0.0 }
 0x123   :  { %273 = vmatprep.mubr.f32.mxu1 %v172_v2 }
 0x124   :  { %274 = vmatmul.mubr.f32.vlgmr.msra.gmra.mrb[0].mxu1 %v171_v3 }
 0x125   :  { %618 = vmatprep.mubr.msk.f32.mxu1 %vm823_vm0, %v821_v0  ;;  %711 = vmatpush3.bf16.msra.mxu1 %v710_v13  ;;  %v375_v0 = vld [vmem:[%s1030_s4 + $0x20] sm:$0xff]  ;;  %s787_s4 = scalar_lea.vmem %s470_s17, 128 }
 0x126   :  { %712 = vmatprep.subr.bf16.mxu1 %v822_v38  ;;  %v716_v17 = vpack.c.bf16 %v376_v16, %v375_v0  ;;  %p788_p2 = scmp.ne.s32.totalorder %s470_s17, %s787_s4  ;;  %p793_p4 = scmp.lt.s32.totalorder %s787_s4, %s787_s4 }
 0x128   :  { %p794_p5 = por %p793_p4, %p792_p3 }
 0x129   :  { %714 = vmatpush3.bf16.msra.mxu1 %v713_v15 }
 0x12a   :  { %715 = vmatprep.subr.bf16.mxu1 %v822_v38  ;;  %p795_p6 = pnand %p794_p5, %p788_p2 }
 0x12d   :  { %717 = vmatpush3.bf16.msra.mxu1 %v716_v17 }
 0x12e   :  { %718 = vmatprep.subr.bf16.mxu1 %v822_v38 }
 0x131   :  { %720 = vmatpush3.bf16.msra.mxu1 %v719_v20 }
 0x132   :  { %721 = vmatprep.subr.bf16.mxu1 %v822_v38 }
 0x135   :  { %723 = vmatpush3.bf16.msra.mxu1 %v722_v23 }
 0x136   :  { %724 = vmatprep.subr.bf16.mxu1 %v822_v38 }
 0x139   :  { %726 = vmatpush3.bf16.msra.mxu1 %v725_v26 }
 0x13a   :  { %727 = vmatprep.subr.bf16.mxu1 %v822_v38 }
 0x13d   :  { %729 = vmatpush3.bf16.msra.mxu1 %v728_v29 }
 0x13e   :  { %730 = vmatprep.subr.bf16.mxu1 %v822_v38  ;;  %v480_v38 = vld [vmem:[%s1031_s5 + $0x2] ss:$0 sm:$0xff] }
 0x141   :  { %732 = vmatpush3.bf16.msra.mxu1 %v731_v39 }
 0x1f7   :  { %v514_v30 = vpop.f32.mrb[0].mxu1 }
 0x1f8   :  { %v515_v32 = vpop.f32.mrb[1].mxu1 }
 0x1f9   :  { %v516_v33 = vadd.f32 %v515_v32, %v514_v30 }
 0x1fb   :  { %v276_v34 = vadd.f32 %v516_v33, %v479_v31 }
 0x1fd   :  { %v279_v35 = vmax.f32 %v276_v34, 0.0 }
 0x1ff   :  { %584 = vmatmul.mubr.f32.vlgmr.msra.gmra.mrb[2].mxu0 %v279_v35 }
 0x2d2   :  { %v366_v40 = vpop.f32.mrb[2].mxu0 }
 0x2d3   :  { %v367_v41 = vadd.f32 %v480_v38, %v366_v40  ;;  %v585_v42 = vpop.f32.mrb[3].mxu0 }
 0x2d5   :  { %v370_v43 = vmax.f32 %v367_v41, 0.0 }
 0x2d7   :  { %619 = vmatmul.mubr.f32.vlgmr.msra.gmra.mrb[2].mxu1 %v370_v43 }
 0x3aa   :  { %v457_v45 = vpop.f32.mrb[2].mxu1 }
 0x3ab   :  { %v458_v46 = vadd.f32 %v481_v44, %v457_v45  ;;  %v620_v47 = vpop.f32.mrb[3].mxu1 }
 0x3ad   :  { %462 = vst.msk [vmem:[#allocation7] sm:$0xff] %vm461_vm1, %v458_v46 }
 0x3ae   :  { %798 = shalt.err (!%p795_p6)
}
 0x3af   :  { %s799_s20 = scalar_lea.hbm %s1032_s6, 128 }
 0x3b0   :  { %p800_p7 = scmp.ne.s32.totalorder %s1032_s6, %s799_s20  ;;  %p803_p8 = scmp.lt.u32.totalorder %s799_s20, %s1032_s6 }
 0x3b2   :  { %p805_p9 = pnand %p803_p8, %p800_p7 }
 0x3b4   :  { %808 = shalt.err (!%p805_p9)
}
 0x3b5   :  { %472 = dma.vmem_to_hbm [thread:$0]  %s470_s17, 128, %s1032_s6, [#allocation4]  }
 0x3b6   :  { %813 = dma.done.wait [#allocation4], 128  }
 0x3b7   :  { %814 = vsyncadd [#allocation4], 4294967168 }
 0x3b8   :  { %476 = vsyncpa [#allocation3], 1 }
 0x3b9   :  { %477 = vsyncpa [#allocation6], 1 }
 0x3ba   :  { %478 = vsyncpa [#allocation4], 1 }

</bundles_post_ra>
